<compile_context>
chip_gen: v6e
topology: v6e:2x2x1
jax: 0.10.0
libtpu: 0.0.40
codegen_flags: <defaults>
</compile_context>

<pallas_src>
import jax
import jax.numpy as jnp
from jax.experimental import pallas as pl
from jax.experimental.pallas import tpu as pltpu


def _round_up(n, m):
    return ((n + m - 1) // m) * m


def qnet_kernel(x_ref, w1_ref, b1_ref, w2_ref, b2_ref, w3_ref, b3_ref,
                w4_ref, b4_ref, o_ref):
    # fc1 + relu : (TB, D) @ (D, 128) -> (TB, 128), f32 accumulation on the MXU.
    h1 = jnp.dot(x_ref[...], w1_ref[...], preferred_element_type=jnp.float32)
    h1 = jnp.maximum(h1 + b1_ref[...], 0.0)
    # dropout(p=0.2): identity in eval mode.
    # fc2 + relu : (TB, 128) @ (128, 64) -> (TB, 64)
    h2 = jnp.dot(h1, w2_ref[...], preferred_element_type=jnp.float32)
    h2 = jnp.maximum(h2 + b2_ref[...], 0.0)
    # fc3 + relu : (TB, 64) @ (64, 32) -> (TB, 32)
    h3 = jnp.dot(h2, w3_ref[...], preferred_element_type=jnp.float32)
    h3 = jnp.maximum(h3 + b3_ref[...], 0.0)
    # output head (fan_out = 1): VPU multiply + lane reduce; bias scalar from SMEM.
    out_col = jnp.sum(h3 * w4_ref[...], axis=-1, keepdims=True) + b4_ref[0, 0]  # (TB, 1)
    # Transpose to batch-on-lanes so the writeback is a lane-dense (1, 1, TB) store.
    out_row = jnp.transpose(out_col)                                            # (1, TB)
    o_ref[...] = out_row.reshape(o_ref.shape).astype(o_ref.dtype)


def _choose_batch_tile(B, max_tile):
    """Batch tile: multiple of 8, as large as possible (amortizes per-grid-step
    overhead on v5e/v6e), but split into >=2 tiles whenever the batch allows so
    the 'parallel' axis can shard across both TensorCores on v7x."""
    b8 = _round_up(max(B, 1), 8)
    if b8 <= 8:
        return 8
    if b8 <= max_tile:
        return _round_up(pl.cdiv(b8, 2), 8)
    return max_tile


def qnetwork_forward(x, params, *, max_tile=1024):
    """x: (B, input_dim) float32. params: w1..w4 as (in,out), b1..b4 as (1,out)."""
    B, D = x.shape
    tb = _choose_batch_tile(B, max_tile)
    n_tiles = pl.cdiv(B, tb)

    w1, w2, w3 = params["w1"], params["w2"], params["w3"]
    b1, b2, b3 = params["b1"], params["b2"], params["b3"]
    w4 = params["w4"].reshape(1, -1).astype(jnp.float32)   # (1, 32) row for the VPU head
    b4 = params["b4"].reshape(1, 1).astype(jnp.float32)    # scalar, lives in SMEM

    # Constant block index -> weight/bias blocks stay VMEM-resident across grid steps.
    resident = lambda a: pl.BlockSpec(a.shape, lambda i: (0,) * a.ndim)

    out = pl.pallas_call(
        qnet_kernel,
        # Lane-dense output: one (1, TB) row of Q-values per batch tile.
        out_shape=jax.ShapeDtypeStruct((n_tiles, 1, tb), jnp.float32),
        grid_spec=pltpu.PrefetchScalarGridSpec(
            num_scalar_prefetch=0,
            grid=(n_tiles,),
            in_specs=[
                pl.BlockSpec((tb, D), lambda i: (i, 0)),             # x batch tile
                resident(w1), resident(b1),
                resident(w2), resident(b2),
                resident(w3), resident(b3),
                resident(w4),
                pl.BlockSpec(memory_space=pltpu.MemorySpace.SMEM),   # b4 scalar
            ],
            out_specs=pl.BlockSpec((1, 1, tb), lambda i: (i, 0, 0)),
        ),
        compiler_params=pltpu.CompilerParams(
            dimension_semantics=("parallel",),   # megacore sharding on v7x
        ),
    )(x.astype(jnp.float32), w1, b1, w2, b2, w3, b3, w4, b4)

    # (n_tiles, 1, tb) -> (n_tiles*tb, 1); drop the ragged-tail rows of the last tile.
    return out.reshape(-1, 1)[:B]


def init_params(key, input_dim):
    """Deterministic init mimicking PyTorch nn.Linear default: U(-1/sqrt(fan_in), 1/sqrt(fan_in))."""
    dims = [(input_dim, 128), (128, 64), (64, 32), (32, 1)]
    params = {}
    keys = jax.random.split(key, 2 * len(dims))
    for i, (fan_in, fan_out) in enumerate(dims):
        bound = 1.0 / (fan_in ** 0.5)
        w = jax.random.uniform(keys[2 * i], (fan_in, fan_out),
                               minval=-bound, maxval=bound, dtype=jnp.float32)
        b = jax.random.uniform(keys[2 * i + 1], (1, fan_out),
                               minval=-bound, maxval=bound, dtype=jnp.float32)
        params[f"w{i + 1}"] = w
        params[f"b{i + 1}"] = b
    return params


if __name__ == "__main__":
    key = jax.random.PRNGKey(0)
    k_x, k_p = jax.random.split(key)

    batch, input_dim = 8, 32
    x = jax.random.normal(k_x, (batch, input_dim), dtype=jnp.float32)
    params = init_params(k_p, input_dim)

    out = jax.block_until_ready(qnetwork_forward(x, params))

    # Pure-JAX f32 reference (matches the PyTorch f32 QNetwork in eval mode).
    def ref(x, p):
        h = jnp.maximum(jnp.dot(x, p["w1"], preferred_element_type=jnp.float32) + p["b1"], 0.0)
        h = jnp.maximum(jnp.dot(h, p["w2"], preferred_element_type=jnp.float32) + p["b2"], 0.0)
        h = jnp.maximum(jnp.dot(h, p["w3"], preferred_element_type=jnp.float32) + p["b3"], 0.0)
        return jnp.dot(h, p["w4"], preferred_element_type=jnp.float32) + p["b4"]

    expected = ref(x, params)
    assert out.shape == (batch, 1), out.shape
    assert jnp.allclose(out, expected, atol=1e-3, rtol=1e-3), "mismatch vs reference"
    print("KERNEL_OK")
</pallas_src>

<mosaic_0001>
module attributes {stable_mosaic.version = 11 : i64} {
  func.func @qnet_kernel(%arg0: i32, %arg1: memref<8x32xf32, #tpu.memory_space<vmem>>, %arg2: memref<32x128xf32, #tpu.memory_space<vmem>>, %arg3: memref<1x128xf32, #tpu.memory_space<vmem>>, %arg4: memref<128x64xf32, #tpu.memory_space<vmem>>, %arg5: memref<1x64xf32, #tpu.memory_space<vmem>>, %arg6: memref<64x32xf32, #tpu.memory_space<vmem>>, %arg7: memref<1x32xf32, #tpu.memory_space<vmem>>, %arg8: memref<1x32xf32, #tpu.memory_space<vmem>>, %arg9: memref<1x1xf32, #tpu.memory_space<smem>>, %arg10: memref<1x1x8xf32, #tpu.memory_space<vmem>>) attributes {dimension_semantics = [#tpu.dimension_semantics<parallel>], iteration_bounds = array<i64: 1>, scalar_prefetch = 0 : i64, scratch_operands = 0 : i64, tpu.core_type = #tpu.core_type<tc>, window_params = [{transform_indices = @transform_0, window_bounds = array<i64: 8, 32>}, {pipeline_mode = #tpu.pipeline_mode<synchronous>, transform_indices = @transform_1, window_bounds = array<i64: 32, 128>}, {pipeline_mode = #tpu.pipeline_mode<synchronous>, transform_indices = @transform_2, window_bounds = array<i64: 1, 128>}, {pipeline_mode = #tpu.pipeline_mode<synchronous>, transform_indices = @transform_3, window_bounds = array<i64: 128, 64>}, {pipeline_mode = #tpu.pipeline_mode<synchronous>, transform_indices = @transform_4, window_bounds = array<i64: 1, 64>}, {pipeline_mode = #tpu.pipeline_mode<synchronous>, transform_indices = @transform_5, window_bounds = array<i64: 64, 32>}, {pipeline_mode = #tpu.pipeline_mode<synchronous>, transform_indices = @transform_6, window_bounds = array<i64: 1, 32>}, {pipeline_mode = #tpu.pipeline_mode<synchronous>, transform_indices = @transform_7, window_bounds = array<i64: 1, 32>}, {transform_indices = @transform_8, window_bounds = array<i64: 1, 1>}, {transform_indices = @transform_9, window_bounds = array<i64: 1, 1, 8>}]} {
    %c0 = arith.constant 0 : index
    %c0_0 = arith.constant 0 : index
    %0 = vector.load %arg1[%c0, %c0_0] : memref<8x32xf32, #tpu.memory_space<vmem>>, vector<8x32xf32>
    %c0_1 = arith.constant 0 : index
    %c0_2 = arith.constant 0 : index
    %1 = vector.load %arg2[%c0_1, %c0_2] : memref<32x128xf32, #tpu.memory_space<vmem>>, vector<32x128xf32>
    %cst = arith.constant dense<0.000000e+00> : vector<8x128xf32>
    %2 = tpu.matmul %0, %1, %cst {dimension_numbers = #tpu.dot_dimension_numbers<[1], [0], [0], [1], [0, 0, 1, 1], [], []>} : vector<8x32xf32>, vector<32x128xf32>, vector<8x128xf32> -> vector<8x128xf32>
    %c0_3 = arith.constant 0 : index
    %c0_4 = arith.constant 0 : index
    %3 = vector.load %arg3[%c0_3, %c0_4] : memref<1x128xf32, #tpu.memory_space<vmem>>, vector<1x128xf32>
    %4 = vector.broadcast %3 : vector<1x128xf32> to vector<8x128xf32>
    %5 = arith.addf %2, %4 : vector<8x128xf32>
    %cst_5 = arith.constant 0.000000e+00 : f32
    %6 = vector.broadcast %cst_5 : f32 to vector<8x128xf32>
    %7 = arith.maximumf %5, %6 : vector<8x128xf32>
    %c0_6 = arith.constant 0 : index
    %c0_7 = arith.constant 0 : index
    %8 = vector.load %arg4[%c0_6, %c0_7] : memref<128x64xf32, #tpu.memory_space<vmem>>, vector<128x64xf32>
    %cst_8 = arith.constant dense<0.000000e+00> : vector<8x64xf32>
    %9 = tpu.matmul %7, %8, %cst_8 {dimension_numbers = #tpu.dot_dimension_numbers<[1], [0], [0], [1], [0, 0, 1, 1], [], []>} : vector<8x128xf32>, vector<128x64xf32>, vector<8x64xf32> -> vector<8x64xf32>
    %c0_9 = arith.constant 0 : index
    %c0_10 = arith.constant 0 : index
    %10 = vector.load %arg5[%c0_9, %c0_10] : memref<1x64xf32, #tpu.memory_space<vmem>>, vector<1x64xf32>
    %11 = vector.broadcast %10 : vector<1x64xf32> to vector<8x64xf32>
    %12 = arith.addf %9, %11 : vector<8x64xf32>
    %cst_11 = arith.constant 0.000000e+00 : f32
    %13 = vector.broadcast %cst_11 : f32 to vector<8x64xf32>
    %14 = arith.maximumf %12, %13 : vector<8x64xf32>
    %c0_12 = arith.constant 0 : index
    %c0_13 = arith.constant 0 : index
    %15 = vector.load %arg6[%c0_12, %c0_13] : memref<64x32xf32, #tpu.memory_space<vmem>>, vector<64x32xf32>
    %cst_14 = arith.constant dense<0.000000e+00> : vector<8x32xf32>
    %16 = tpu.matmul %14, %15, %cst_14 {dimension_numbers = #tpu.dot_dimension_numbers<[1], [0], [0], [1], [0, 0, 1, 1], [], []>} : vector<8x64xf32>, vector<64x32xf32>, vector<8x32xf32> -> vector<8x32xf32>
    %c0_15 = arith.constant 0 : index
    %c0_16 = arith.constant 0 : index
    %17 = vector.load %arg7[%c0_15, %c0_16] : memref<1x32xf32, #tpu.memory_space<vmem>>, vector<1x32xf32>
    %18 = vector.broadcast %17 : vector<1x32xf32> to vector<8x32xf32>
    %19 = arith.addf %16, %18 : vector<8x32xf32>
    %cst_17 = arith.constant 0.000000e+00 : f32
    %20 = vector.broadcast %cst_17 : f32 to vector<8x32xf32>
    %21 = arith.maximumf %19, %20 : vector<8x32xf32>
    %c0_18 = arith.constant 0 : index
    %c0_19 = arith.constant 0 : index
    %22 = vector.load %arg8[%c0_18, %c0_19] : memref<1x32xf32, #tpu.memory_space<vmem>>, vector<1x32xf32>
    %23 = vector.broadcast %22 : vector<1x32xf32> to vector<8x32xf32>
    %24 = arith.mulf %21, %23 : vector<8x32xf32>
    %cst_20 = arith.constant dense<0.000000e+00> : vector<8xf32>
    %25 = vector.multi_reduction <add>, %24, %cst_20 [1] : vector<8x32xf32> to vector<8xf32>
    %26 = vector.shape_cast %25 : vector<8xf32> to vector<8x1xf32>
    %c0_21 = arith.constant 0 : index
    %c0_22 = arith.constant 0 : index
    %27 = memref.load %arg9[%c0_21, %c0_22] : memref<1x1xf32, #tpu.memory_space<smem>>
    %28 = vector.broadcast %27 : f32 to vector<8x1xf32>
    %29 = arith.addf %26, %28 : vector<8x1xf32>
    %30 = tpu.transpose %29, [1, 0] : vector<8x1xf32> -> vector<1x8xf32>
    %31 = vector.shape_cast %30 : vector<1x8xf32> to vector<1x1x8xf32>
    %c0_23 = arith.constant 0 : index
    %c0_24 = arith.constant 0 : index
    %c0_25 = arith.constant 0 : index
    %32 = vector.load %arg10[%c0_23, %c0_24, %c0_25] : memref<1x1x8xf32, #tpu.memory_space<vmem>>, vector<1x1x8xf32>
    tpu.vector_store %arg10[%c0_23, %c0_24, %c0_25], %31 {strides = array<i32>} : memref<1x1x8xf32, #tpu.memory_space<vmem>>, vector<1x1x8xf32>,
    return
  }
  func.func @transform_0(%arg0: i32) -> (i32, i32) {
    %c0_i32 = arith.constant 0 : i32
    %c0_i32_0 = arith.constant 0 : i32
    return %arg0, %c0_i32 : i32, i32
  }
  func.func @transform_1(%arg0: i32) -> (i32, i32) {
    %c0_i32 = arith.constant 0 : i32
    %c0_i32_0 = arith.constant 0 : i32
    %c0_i32_1 = arith.constant 0 : i32
    return %c0_i32, %c0_i32_0 : i32, i32
  }
  func.func @transform_2(%arg0: i32) -> (i32, i32) {
    %c0_i32 = arith.constant 0 : i32
    %c0_i32_0 = arith.constant 0 : i32
    %c0_i32_1 = arith.constant 0 : i32
    return %c0_i32, %c0_i32_0 : i32, i32
  }
  func.func @transform_3(%arg0: i32) -> (i32, i32) {
    %c0_i32 = arith.constant 0 : i32
    %c0_i32_0 = arith.constant 0 : i32
    %c0_i32_1 = arith.constant 0 : i32
    return %c0_i32, %c0_i32_0 : i32, i32
  }
  func.func @transform_4(%arg0: i32) -> (i32, i32) {
    %c0_i32 = arith.constant 0 : i32
    %c0_i32_0 = arith.constant 0 : i32
    %c0_i32_1 = arith.constant 0 : i32
    return %c0_i32, %c0_i32_0 : i32, i32
  }
  func.func @transform_5(%arg0: i32) -> (i32, i32) {
    %c0_i32 = arith.constant 0 : i32
    %c0_i32_0 = arith.constant 0 : i32
    %c0_i32_1 = arith.constant 0 : i32
    return %c0_i32, %c0_i32_0 : i32, i32
  }
  func.func @transform_6(%arg0: i32) -> (i32, i32) {
    %c0_i32 = arith.constant 0 : i32
    %c0_i32_0 = arith.constant 0 : i32
    %c0_i32_1 = arith.constant 0 : i32
    return %c0_i32, %c0_i32_0 : i32, i32
  }
  func.func @transform_7(%arg0: i32) -> (i32, i32) {
    %c0_i32 = arith.constant 0 : i32
    %c0_i32_0 = arith.constant 0 : i32
    %c0_i32_1 = arith.constant 0 : i32
    return %c0_i32, %c0_i32_0 : i32, i32
  }
  func.func @transform_8(%arg0: i32) -> (i32, i32) {
    %c0_i32 = arith.constant 0 : i32
    %c0_i32_0 = arith.constant 0 : i32
    %c0_i32_1 = arith.constant 0 : i32
    return %c0_i32, %c0_i32_0 : i32, i32
  }
  func.func @transform_9(%arg0: i32) -> (i32, i32, i32) {
    %c0_i32 = arith.constant 0 : i32
    %c0_i32_0 = arith.constant 0 : i32
    %c0_i32_1 = arith.constant 0 : i32
    return %arg0, %c0_i32, %c0_i32_0 : i32, i32, i32
  }
}

</mosaic_0001>

<bundles_post_ra>
// kernel: tpu_custom_call.1
= control target key start
LH: loop header
LB: loop body
LE: loop exit
PB: predicated region body
PF: predicated region fallthrough
CT: control target
= control target key end

     0   :  { %v494_v1 = vmov 0.0   ;;  %vm495_vm0 = vmmov 0   ;;  %vm46_vm1 = vcmask 261120   ;;  %s688_s0 = inlined_call_operand.vmem [shape: f32[8,32], index: 0, kind: input, shape index: {}]   ;;  %s689_s1 = inlined_call_operand.vmem [shape: f32[32,128], index: 1, kind: input, shape index: {}]   ;;  %s690_s2 = inlined_call_operand.vmem [shape: f32[1,128], index: 2, kind: input, shape index: {}]   ;;  %s691_s3 = inlined_call_operand.vmem [shape: f32[128,64], index: 3, kind: input, shape index: {}]   ;;  %s692_s4 = inlined_call_operand.vmem [shape: f32[1,64], index: 4, kind: input, shape index: {}]   ;;  %s693_s5 = inlined_call_operand.vmem [shape: f32[64,32], index: 5, kind: input, shape index: {}]   ;;  %s694_s6 = inlined_call_operand.vmem [shape: f32[1,32], index: 6, kind: input, shape index: {}]   ;;  %s695_s7 = inlined_call_operand.vmem [shape: f32[1,32], index: 7, kind: input, shape index: {}]   ;;  %s696_s8 = inlined_call_operand.<no memory space> [shape: f32[1,1], index: 8, kind: input, shape index: {}]   ;;  %s697_s9 = inlined_call_operand.hbm [shape: f32[1,1,8], index: 9, kind: output, shape index: {}]  }
   0x1   :  { %v38_v0 = vld [vmem:[%s689_s1 + $0x18] sm:$0xff]  ;;  %404 = vmatprep.subr.mxu0 %v494_v1  ;;  %v37_v2 = vld [vmem:[%s689_s1 + $0x10] sm:$0xff]  ;;  %412 = vmatprep.mubr.msk.f32.mxu0 %vm495_vm0, %v494_v1  ;;  %v36_v5 = vld [vmem:[%s689_s1 + $0x8] sm:$0xff] }
   0x2   :  { %v136_v3 = vld [vmem:[%s691_s3 + $0x78] sm:$0xff]  ;;  %405 = vmatpush3.msra.mxu0 %v38_v0  ;;  %415 = vmatprep.subr.mxu1 %v494_v1  ;;  %v135_v4 = vld [vmem:[%s691_s3 + $0x70] sm:$0xff]  ;;  %v134_v6 = vld [vmem:[%s691_s3 + $0x68] sm:$0xff] }
   0x3   :  { %406 = vmatprep.subr.mxu0 %v494_v1  ;;  %416 = vmatpush3.msra.mxu1 %v136_v3  ;;  %v35_v7 = vld [vmem:[%s689_s1] sm:$0xff] }
   0x4   :  { %407 = vmatpush3.msra.mxu0 %v37_v2  ;;  %417 = vmatprep.subr.mxu1 %v494_v1  ;;  %v34_v8 = vld [vmem:[%s688_s0] sm:$0xff] }
   0x5   :  { %408 = vmatprep.subr.mxu0 %v494_v1  ;;  %418 = vmatpush3.msra.mxu1 %v135_v4  ;;  %v133_v9 = vld [vmem:[%s691_s3 + $0x60] sm:$0xff] }
   0x6   :  { %409 = vmatpush3.msra.mxu0 %v36_v5  ;;  %419 = vmatprep.subr.mxu1 %v494_v1 }
   0x7   :  { %15 = vsyncpa [#allocation4], 0  ;;  %410 = vmatprep.subr.mxu0 %v494_v1  ;;  %420 = vmatpush3.msra.mxu1 %v134_v6  ;;  %v132_v10 = vld [vmem:[%s691_s3 + $0x58] sm:$0xff]  ;;  %v131_v11 = vld [vmem:[%s691_s3 + $0x50] sm:$0xff]  ;;  %vm230_vm2 = vcmask 523264   ;;  %v317_v48 = vstv %s696_s8  ;;  %vm351_vm3 = vcmask 57344  }
   0x8   :  { %411 = vmatpush3.msra.mxu0 %v35_v7  ;;  %421 = vmatprep.subr.mxu1 %v494_v1  ;;  %v130_v12 = vld [vmem:[%s691_s3 + $0x48] sm:$0xff]  ;;  %v129_v13 = vld [vmem:[%s691_s3 + $0x40] sm:$0xff]  ;;  %v128_v14 = vld [vmem:[%s691_s3 + $0x38] sm:$0xff] }
   0x9   :  { %413 = vmatmul.mubr.msk.f32.vlgmr.msra.gmra.mxu0 %vm46_vm1, %v34_v8  ;;  %422 = vmatpush3.msra.mxu1 %v133_v9  ;;  %v127_v15 = vld [vmem:[%s691_s3 + $0x30] sm:$0xff]  ;;  %v126_v16 = vld [vmem:[%s691_s3 + $0x28] sm:$0xff]  ;;  %v125_v17 = vld [vmem:[%s691_s3 + $0x20] sm:$0xff] }
   0xa   :  { %423 = vmatprep.subr.mxu1 %v494_v1  ;;  %447 = vmatprep.mubr.msk.f32.mxu1 %vm495_vm0, %v494_v1  ;;  %v124_v18 = vld [vmem:[%s691_s3 + $0x18] sm:$0xff]  ;;  %v123_v19 = vld [vmem:[%s691_s3 + $0x10] sm:$0xff]  ;;  %v122_v20 = vld [vmem:[%s691_s3 + $0x8] sm:$0xff] }
   0xb   :  { %424 = vmatpush3.msra.mxu1 %v132_v10  ;;  %450 = vmatprep.subr.mxu0 %v494_v1  ;;  %v121_v21 = vld [vmem:[%s691_s3] sm:$0xff]  ;;  %v222_v22 = vld [vmem:[%s693_s5 + $0x38] sm:$0xff]  ;;  %v221_v23 = vld [vmem:[%s693_s5 + $0x30] sm:$0xff] }
   0xc   :  { %425 = vmatprep.subr.mxu1 %v494_v1  ;;  %466 = vmatprep.mubr.msk.f32.mxu0 %vm495_vm0, %v494_v1  ;;  %v220_v24 = vld [vmem:[%s693_s5 + $0x28] sm:$0xff]  ;;  %v219_v25 = vld [vmem:[%s693_s5 + $0x20] sm:$0xff]  ;;  %v218_v26 = vld [vmem:[%s693_s5 + $0x18] sm:$0xff] }
   0xd   :  { %426 = vmatpush3.msra.mxu1 %v131_v11  ;;  %451 = vmatpush3.msra.mxu0 %v222_v22  ;;  %v367_v27 = vld [vmem:[%s690_s2] ss:$0 sm:$0xff]  ;;  %v217_v32 = vld [vmem:[%s693_s5 + $0x10] sm:$0xff]  ;;  %v216_v33 = vld [vmem:[%s693_s5 + $0x8] sm:$0xff] }
   0xe   :  { %427 = vmatprep.subr.mxu1 %v494_v1  ;;  %452 = vmatprep.subr.mxu0 %v494_v1  ;;  %v215_v34 = vld [vmem:[%s693_s5] sm:$0xff] }
   0xf   :  { %428 = vmatpush3.msra.mxu1 %v130_v12  ;;  %453 = vmatpush3.msra.mxu0 %v221_v23  ;;  %v369_v35 = vld [vmem:[%s692_s4] ss:$0 sm:$0xff] }
  0x10   :  { %429 = vmatprep.subr.mxu1 %v494_v1  ;;  %454 = vmatprep.subr.mxu0 %v494_v1  ;;  %v370_v40 = vld [vmem:[%s694_s6] ss:$0 sm:$0xff]  ;;  %s496_s6 = smov [#allocation3]  }
  0x11   :  { %430 = vmatpush3.msra.mxu1 %v129_v13  ;;  %455 = vmatpush3.msra.mxu0 %v220_v24  ;;  %v372_v44 = vld [vmem:[%s695_s7] ss:$0 sm:$0xff]  ;;  %s359_s1 = sshll.u32 %s496_s6, 4  ;;  %s360_s1 = int_to_ptr.vmem [resolvable:$true] %s359_s1 }
  0x12   :  { %431 = vmatprep.subr.mxu1 %v494_v1  ;;  %456 = vmatprep.subr.mxu0 %v494_v1  ;;  %s472_s27 = scalar_lea.vmem %s360_s1, 16  ;;  %s476_s7 = scalar_lea.vmem %s360_s1, 32 }
  0x13   :  { %432 = vmatpush3.msra.mxu1 %v128_v14  ;;  %457 = vmatpush3.msra.mxu0 %v219_v25  ;;  %p473_p0 = scmp.ne.s32.totalorder %s360_s1, %s472_s27  ;;  %p477_p1 = scmp.lt.s32.totalorder %s360_s1, %s360_s1 }
  0x14   :  { %433 = vmatprep.subr.mxu1 %v494_v1  ;;  %458 = vmatprep.subr.mxu0 %v494_v1  ;;  %p478_p2 = scmp.lt.s32.totalorder %s476_s7, %s472_s27 }
  0x15   :  { %434 = vmatpush3.msra.mxu1 %v127_v15  ;;  %459 = vmatpush3.msra.mxu0 %v218_v26 }
  0x16   :  { %435 = vmatprep.subr.mxu1 %v494_v1  ;;  %460 = vmatprep.subr.mxu0 %v494_v1  ;;  %p479_p3 = por %p478_p2, %p477_p1 }
  0x17   :  { %436 = vmatpush3.msra.mxu1 %v126_v16  ;;  %461 = vmatpush3.msra.mxu0 %v217_v32 }
  0x18   :  { %437 = vmatprep.subr.mxu1 %v494_v1  ;;  %462 = vmatprep.subr.mxu0 %v494_v1  ;;  %p480_p4 = pnand %p479_p3, %p473_p0 }
  0x19   :  { %438 = vmatpush3.msra.mxu1 %v125_v17  ;;  %463 = vmatpush3.msra.mxu0 %v216_v33 }
  0x1a   :  { %439 = vmatprep.subr.mxu1 %v494_v1  ;;  %464 = vmatprep.subr.mxu0 %v494_v1 }
  0x1b   :  { %440 = vmatpush3.msra.mxu1 %v124_v18  ;;  %465 = vmatpush3.msra.mxu0 %v215_v34 }
  0x1c   :  { %441 = vmatprep.subr.mxu1 %v494_v1 }
  0x1d   :  { %442 = vmatpush3.msra.mxu1 %v123_v19 }
  0x1e   :  { %443 = vmatprep.subr.mxu1 %v494_v1 }
  0x1f   :  { %444 = vmatpush3.msra.mxu1 %v122_v20 }
  0x20   :  { %445 = vmatprep.subr.mxu1 %v494_v1 }
  0x21   :  { %446 = vmatpush3.msra.mxu1 %v121_v21 }
  0xc9   :  { %v116_v28 = vpop.f32.mrf.mxu0 }
  0xca   :  { %v117_v29 = vadd.f32 %v367_v27, %v116_v28 }
  0xcb   :  { %v414_v30 = vpop.f32.mrf.mxu0 }
  0xcc   :  { %v120_v31 = vmax.f32 %v117_v29, 0.0 }
  0xce   :  { %448 = vmatmul.mubr.f32.vlgmr.msra.gmra.mxu1 %v120_v31 }
 0x18e   :  { %v210_v36 = vpop.f32.mrf.mxu1 }
 0x18f   :  { %v211_v37 = vadd.f32 %v369_v35, %v210_v36 }
 0x190   :  { %v449_v38 = vpop.f32.mrf.mxu1 }
 0x191   :  { %v214_v39 = vmax.f32 %v211_v37, 0.0 }
 0x193   :  { %467 = vmatmul.mubr.msk.f32.vlgmr.msra.gmra.mxu0 %vm230_vm2, %v214_v39 }
 0x253   :  { %v300_v41 = vpop.f32.mrf.mxu0 }
 0x254   :  { %v301_v42 = vadd.f32 %v370_v40, %v300_v41 }
 0x255   :  { %v468_v43 = vpop.f32.mrf.mxu0 }
 0x256   :  { %v304_v45 = vmax.f32 %v301_v42, 0.0 }
 0x258   :  { %v312_v46 = vmul.f32 %v372_v44, %v304_v45 }
 0x25a   :  { %v313_v47 = vsel %vm46_vm1, %v312_v46, 0.0 }
 0x25b   :  { %314 = vadd.xlane.f32.xlu0 %v313_v47 }
 0x2e4   :  { %v315_v49 = vpop.xlane.xlu0 %314 }
 0x2e5   :  { %v318_v50 = vadd.f32 %v317_v48, %v315_v49 }
 0x2e7   :  { %319 = vxpose.xlu0.b32.start.end [1/1] (short) (narrow) %v318_v50, 8 }
 0x363   :  { %v335_v51 = vpop.trf.xlu0 }
 0x364   :  { %352 = vst.msk [vmem:[#allocation3] sm:$0x1] %vm351_vm3, %v335_v51 }
 0x365   :  { %483 = shalt.err (!%p480_p4)
}
 0x366   :  { %362 = dma.vmem_to_hbm [thread:$0]  %s360_s1, 16, %s697_s9, [#allocation4]  }
 0x367   :  { %492 = dma.done.wait [#allocation4], 16  }
 0x368   :  { %493 = vsyncadd [#allocation4], 4294967280 }
 0x369   :  { %366 = vsyncpa [#allocation4], 1 }

</bundles_post_ra>
